<compile_context>
chip_gen: v7x
topology: tpu7x:2x2x1
jax: 0.10.0
libtpu: 0.0.40
codegen_flags: <defaults>
</compile_context>

<pallas_src>
import jax
import jax.numpy as jnp
from jax.experimental import pallas as pl
from jax.experimental.pallas import tpu as pltpu


def _conv_rows_kernel(x_ref, w_ref, b_ref, o_ref, xpad_ref):
    # x_ref   : (NB, H,   W*Cin )  input rows (NHWC with minor dims collapsed)
    # w_ref   : (3,  W*Cin, W*Cout) block-banded weights, one matrix per kh tap
    # b_ref   : (1,  W*Cout)        bias, already tiled across W (f32)
    # o_ref   : (NB, H,   W*Cout)  output rows (lane-dense: W*Cout lanes)
    # xpad_ref: (NB, H+2, W*Cin )  f32 VMEM scratch, zero rows at 0 and H+1
    nb, hpad, l_in = xpad_ref.shape
    h = hpad - 2
    l_out = o_ref.shape[-1]

    # --- in-kernel height padding (VMEM only; no wrapper jnp.pad HBM pass).
    # The border rows are re-zeroed every grid step on purpose: with
    # "parallel" grid semantics each TensorCore owns its own scratch, so a
    # pl.when(program_id == 0) guard would leave the second core's border
    # uninitialized.  It is only 2 rows -- negligible.
    zero_row = jnp.zeros((nb, 1, l_in), xpad_ref.dtype)
    xpad_ref[:, 0:1, :] = zero_row
    xpad_ref[:, h + 1:h + 2, :] = zero_row
    xpad_ref[:, 1:h + 1, :] = x_ref[...].astype(xpad_ref.dtype)

    bias = b_ref[...]                    # (1, W*Cout), f32
    dot_dtype = w_ref.dtype              # bf16 on the bf16 path, f32 otherwise

    for i in range(nb):                  # static unroll; NB is small
        acc = jnp.zeros((h, l_out), jnp.float32)
        for kh in range(3):              # the 3 kw taps are already folded into K
            lhs = xpad_ref[i, kh:kh + h, :].astype(dot_dtype)
            acc += jnp.dot(lhs, w_ref[kh], preferred_element_type=jnp.float32)
        o_ref[i] = (acc + bias).astype(o_ref.dtype)


def _banded_conv_weights(w_oihw, width, dtype):
    """Fold the 3x3 taps of an OIHW conv weight into 3 block-banded matrices.

    m[kh] has shape (width*Cin, width*Cout) with
        m[kh][(w + kw - 1)*Cin + ci, w*Cout + co] = w_oihw[co, ci, kh, kw]
    and entries whose input column (w + kw - 1) falls outside [0, width) are
    simply absent -> the conv's width zero-padding is baked into the band
    structure, so the kernel only has to zero-pad along H.
    """
    cout, cin, ksz_h, ksz_w = w_oihw.shape
    w32 = w_oihw.astype(jnp.float32)
    mats = []
    for kh in range(ksz_h):
        m = jnp.zeros((width * cin, width * cout), jnp.float32)
        for kw in range(ksz_w):
            band = jnp.eye(width, k=-(kw - 1), dtype=jnp.float32)  # [w+kw-1, w]
            m = m + jnp.kron(band, jnp.transpose(w32[:, :, kh, kw]))
        mats.append(m)
    return jnp.stack(mats).astype(dtype)        # (3, width*Cin, width*Cout)


def _pick_batch_block(n):
    """Largest divisor of n that still leaves >= 2 grid steps (v7x: 2 TCs)."""
    for cand in range(max(1, n // 2), 0, -1):
        if n % cand == 0:
            return cand
    return 1


def channel_expansion_conv(x_nhwc, w_oihw, bias, *, batch_block=None):
    """3x3 conv, stride 1, padding 1, with bias (nn.Conv2d semantics).

    x_nhwc : (N, H, W, Cin)  activations.  Kept NHWC end-to-end -- the
             one-time NCHW<->NHWC conversion of a PyTorch checkpoint belongs
             at the model boundary, not on the per-layer hot path.
    w_oihw : (Cout, Cin, 3, 3)  PyTorch-layout weights.
    bias   : (Cout,)
    Returns (N, H, W, Cout) NHWC, same dtype as x_nhwc (f32 accumulation).
    """
    n, h, width, cin = x_nhwc.shape
    cout, cin_w, ksz_h, ksz_w = w_oihw.shape
    assert (cin_w, ksz_h, ksz_w) == (cin, 3, 3)
    assert bias.shape == (cout,)

    nb = batch_block if batch_block is not None else _pick_batch_block(n)
    assert n % nb == 0

    l_in, l_out = width * cin, width * cout

    # Minor-dim collapse (N,H,W,C) -> (N,H,W*C): free (bitcast) reshape.
    x_rows = x_nhwc.reshape(n, h, l_in)
    # Weight/bias prep is tiny and done once per layer (precomputable).
    w_rows = _banded_conv_weights(w_oihw, width, x_nhwc.dtype)
    b_rows = jnp.tile(bias.astype(jnp.float32), width).reshape(1, l_out)

    out_rows = pl.pallas_call(
        _conv_rows_kernel,
        out_shape=jax.ShapeDtypeStruct((n, h, l_out), x_nhwc.dtype),
        grid_spec=pltpu.PrefetchScalarGridSpec(
            num_scalar_prefetch=0,
            grid=(n // nb,),
            in_specs=[
                pl.BlockSpec((nb, h, l_in), lambda i: (i, 0, 0)),
                pl.BlockSpec((3, l_in, l_out), lambda i: (0, 0, 0)),
                pl.BlockSpec((1, l_out), lambda i: (0, 0)),
            ],
            out_specs=pl.BlockSpec((nb, h, l_out), lambda i: (i, 0, 0)),
            scratch_shapes=[pltpu.VMEM((nb, h + 2, l_in), jnp.float32)],
        ),
        compiler_params=pltpu.CompilerParams(
            dimension_semantics=("parallel",),
            vmem_limit_bytes=32 * 1024 * 1024,
        ),
    )(x_rows, w_rows, b_rows)

    # Minor-dim split (N,H,W*Cout) -> (N,H,W,Cout): free reshape.
    return out_rows.reshape(n, h, width, cout)


if __name__ == "__main__":
    key = jax.random.PRNGKey(0)
    kx, kw, kb = jax.random.split(key, 3)

    # Small shapes in the spirit of the module's early channel-expansion layers.
    N, C_IN, C_OUT, H, W = 8, 4, 8, 16, 16

    x = jax.random.normal(kx, (N, H, W, C_IN), dtype=jnp.float32)
    fan_in = C_IN * 3 * 3
    bound = 1.0 / (fan_in ** 0.5)
    w = jax.random.uniform(kw, (C_OUT, C_IN, 3, 3),
                           minval=-bound, maxval=bound, dtype=jnp.float32)
    b = jax.random.uniform(kb, (C_OUT,),
                           minval=-bound, maxval=bound, dtype=jnp.float32)

    out = channel_expansion_conv(x, w, b)
    out = jax.block_until_ready(out)
    assert out.shape == (N, H, W, C_OUT)

    # Reference: XLA conv with the exact nn.Conv2d(..., padding=1) semantics.
    w_hwio = jnp.transpose(w, (2, 3, 1, 0))
    ref = jax.lax.conv_general_dilated(
        x, w_hwio, window_strides=(1, 1), padding=((1, 1), (1, 1)),
        dimension_numbers=("NHWC", "HWIO", "NHWC")) + b[None, None, None, :]
    ref = jax.block_until_ready(ref)
    assert jnp.allclose(out, ref, atol=2e-5, rtol=2e-5)

    # bf16 operands (f32 accumulation): the MXU-native path on v6e/v7x.
    out_bf16 = channel_expansion_conv(x.astype(jnp.bfloat16),
                                      w.astype(jnp.bfloat16), b)
    out_bf16 = jax.block_until_ready(out_bf16)
    assert jnp.allclose(out_bf16.astype(jnp.float32), ref, atol=5e-2, rtol=5e-2)

    print("KERNEL_OK")
</pallas_src>

<mosaic_0001>
module attributes {stable_mosaic.version = 11 : i64} {
  func.func @_conv_rows_kernel(%arg0: i32, %arg1: memref<4x16x64xf32, #tpu.memory_space<vmem>>, %arg2: memref<3x64x128xf32, #tpu.memory_space<vmem>>, %arg3: memref<1x128xf32, #tpu.memory_space<vmem>>, %arg4: memref<4x16x128xf32, #tpu.memory_space<vmem>>, %arg5: memref<4x18x64xf32, #tpu.memory_space<vmem>>) attributes {dimension_semantics = [#tpu.dimension_semantics<parallel>], iteration_bounds = array<i64: 2>, scalar_prefetch = 0 : i64, scratch_operands = 1 : i64, tpu.core_type = #tpu.core_type<tc>, window_params = [{transform_indices = @transform_0, window_bounds = array<i64: 4, 16, 64>}, {pipeline_mode = #tpu.pipeline_mode<synchronous>, transform_indices = @transform_1, window_bounds = array<i64: 3, 64, 128>}, {pipeline_mode = #tpu.pipeline_mode<synchronous>, transform_indices = @transform_2, window_bounds = array<i64: 1, 128>}, {transform_indices = @transform_3, window_bounds = array<i64: 4, 16, 128>}]} {
    %cst = arith.constant 0.000000e+00 : f32
    %0 = vector.broadcast %cst : f32 to vector<4x1x64xf32>
    %c0 = arith.constant 0 : index
    %c0_0 = arith.constant 0 : index
    %c0_1 = arith.constant 0 : index
    %1 = vector.load %arg5[%c0, %c0_0, %c0_1] : memref<4x18x64xf32, #tpu.memory_space<vmem>>, vector<4x1x64xf32>
    tpu.vector_store %arg5[%c0, %c0_0, %c0_1], %0 {strides = array<i32>} : memref<4x18x64xf32, #tpu.memory_space<vmem>>, vector<4x1x64xf32>,
    %c0_2 = arith.constant 0 : index
    %c17 = arith.constant 17 : index
    %c0_3 = arith.constant 0 : index
    %2 = vector.load %arg5[%c0_2, %c17, %c0_3] : memref<4x18x64xf32, #tpu.memory_space<vmem>>, vector<4x1x64xf32>
    tpu.vector_store %arg5[%c0_2, %c17, %c0_3], %0 {strides = array<i32>} : memref<4x18x64xf32, #tpu.memory_space<vmem>>, vector<4x1x64xf32>,
    %c0_4 = arith.constant 0 : index
    %c0_5 = arith.constant 0 : index
    %c0_6 = arith.constant 0 : index
    %3 = vector.load %arg1[%c0_4, %c0_5, %c0_6] : memref<4x16x64xf32, #tpu.memory_space<vmem>>, vector<4x16x64xf32>
    %c0_7 = arith.constant 0 : index
    %c1 = arith.constant 1 : index
    %c0_8 = arith.constant 0 : index
    %4 = vector.load %arg5[%c0_7, %c1, %c0_8] : memref<4x18x64xf32, #tpu.memory_space<vmem>>, vector<4x16x64xf32>
    tpu.vector_store %arg5[%c0_7, %c1, %c0_8], %3 {strides = array<i32>} : memref<4x18x64xf32, #tpu.memory_space<vmem>>, vector<4x16x64xf32>,
    %c0_9 = arith.constant 0 : index
    %c0_10 = arith.constant 0 : index
    %5 = vector.load %arg3[%c0_9, %c0_10] : memref<1x128xf32, #tpu.memory_space<vmem>>, vector<1x128xf32>
    %cst_11 = arith.constant 0.000000e+00 : f32
    %6 = vector.broadcast %cst_11 : f32 to vector<16x128xf32>
    %c0_12 = arith.constant 0 : index
    %c0_13 = arith.constant 0 : index
    %c0_14 = arith.constant 0 : index
    %7 = vector.load %arg5[%c0_12, %c0_13, %c0_14] : memref<4x18x64xf32, #tpu.memory_space<vmem>>, vector<1x16x64xf32>
    %8 = vector.shape_cast %7 : vector<1x16x64xf32> to vector<16x64xf32>
    %c0_15 = arith.constant 0 : index
    %c0_16 = arith.constant 0 : index
    %c0_17 = arith.constant 0 : index
    %9 = vector.load %arg2[%c0_15, %c0_16, %c0_17] : memref<3x64x128xf32, #tpu.memory_space<vmem>>, vector<1x64x128xf32>
    %10 = vector.shape_cast %9 : vector<1x64x128xf32> to vector<64x128xf32>
    %cst_18 = arith.constant dense<0.000000e+00> : vector<16x128xf32>
    %11 = tpu.matmul %8, %10, %cst_18 {dimension_numbers = #tpu.dot_dimension_numbers<[1], [0], [0], [1], [0, 0, 1, 1], [], []>} : vector<16x64xf32>, vector<64x128xf32>, vector<16x128xf32> -> vector<16x128xf32>
    %12 = arith.addf %6, %11 : vector<16x128xf32>
    %c0_19 = arith.constant 0 : index
    %c1_20 = arith.constant 1 : index
    %c0_21 = arith.constant 0 : index
    %13 = vector.load %arg5[%c0_19, %c1_20, %c0_21] : memref<4x18x64xf32, #tpu.memory_space<vmem>>, vector<1x16x64xf32>
    %14 = vector.shape_cast %13 : vector<1x16x64xf32> to vector<16x64xf32>
    %c1_22 = arith.constant 1 : index
    %c0_23 = arith.constant 0 : index
    %c0_24 = arith.constant 0 : index
    %15 = vector.load %arg2[%c1_22, %c0_23, %c0_24] : memref<3x64x128xf32, #tpu.memory_space<vmem>>, vector<1x64x128xf32>
    %16 = vector.shape_cast %15 : vector<1x64x128xf32> to vector<64x128xf32>
    %cst_25 = arith.constant dense<0.000000e+00> : vector<16x128xf32>
    %17 = tpu.matmul %14, %16, %cst_25 {dimension_numbers = #tpu.dot_dimension_numbers<[1], [0], [0], [1], [0, 0, 1, 1], [], []>} : vector<16x64xf32>, vector<64x128xf32>, vector<16x128xf32> -> vector<16x128xf32>
    %18 = arith.addf %12, %17 : vector<16x128xf32>
    %c0_26 = arith.constant 0 : index
    %c2 = arith.constant 2 : index
    %c0_27 = arith.constant 0 : index
    %19 = vector.load %arg5[%c0_26, %c2, %c0_27] : memref<4x18x64xf32, #tpu.memory_space<vmem>>, vector<1x16x64xf32>
    %20 = vector.shape_cast %19 : vector<1x16x64xf32> to vector<16x64xf32>
    %c2_28 = arith.constant 2 : index
    %c0_29 = arith.constant 0 : index
    %c0_30 = arith.constant 0 : index
    %21 = vector.load %arg2[%c2_28, %c0_29, %c0_30] : memref<3x64x128xf32, #tpu.memory_space<vmem>>, vector<1x64x128xf32>
    %22 = vector.shape_cast %21 : vector<1x64x128xf32> to vector<64x128xf32>
    %cst_31 = arith.constant dense<0.000000e+00> : vector<16x128xf32>
    %23 = tpu.matmul %20, %22, %cst_31 {dimension_numbers = #tpu.dot_dimension_numbers<[1], [0], [0], [1], [0, 0, 1, 1], [], []>} : vector<16x64xf32>, vector<64x128xf32>, vector<16x128xf32> -> vector<16x128xf32>
    %24 = arith.addf %18, %23 : vector<16x128xf32>
    %25 = vector.broadcast %5 : vector<1x128xf32> to vector<16x128xf32>
    %26 = arith.addf %24, %25 : vector<16x128xf32>
    %c0_32 = arith.constant 0 : index
    %c0_33 = arith.constant 0 : index
    %c0_34 = arith.constant 0 : index
    %27 = vector.load %arg4[%c0_32, %c0_33, %c0_34] : memref<4x16x128xf32, #tpu.memory_space<vmem>>, vector<1x16x128xf32>
    %28 = vector.shape_cast %27 : vector<1x16x128xf32> to vector<16x128xf32>
    %29 = vector.shape_cast %26 : vector<16x128xf32> to vector<1x16x128xf32>
    tpu.vector_store %arg4[%c0_32, %c0_33, %c0_34], %29 {strides = array<i32>} : memref<4x16x128xf32, #tpu.memory_space<vmem>>, vector<1x16x128xf32>,
    %cst_35 = arith.constant 0.000000e+00 : f32
    %30 = vector.broadcast %cst_35 : f32 to vector<16x128xf32>
    %c1_36 = arith.constant 1 : index
    %c0_37 = arith.constant 0 : index
    %c0_38 = arith.constant 0 : index
    %31 = vector.load %arg5[%c1_36, %c0_37, %c0_38] : memref<4x18x64xf32, #tpu.memory_space<vmem>>, vector<1x16x64xf32>
    %32 = vector.shape_cast %31 : vector<1x16x64xf32> to vector<16x64xf32>
    %c0_39 = arith.constant 0 : index
    %c0_40 = arith.constant 0 : index
    %c0_41 = arith.constant 0 : index
    %33 = vector.load %arg2[%c0_39, %c0_40, %c0_41] : memref<3x64x128xf32, #tpu.memory_space<vmem>>, vector<1x64x128xf32>
    %34 = vector.shape_cast %33 : vector<1x64x128xf32> to vector<64x128xf32>
    %cst_42 = arith.constant dense<0.000000e+00> : vector<16x128xf32>
    %35 = tpu.matmul %32, %34, %cst_42 {dimension_numbers = #tpu.dot_dimension_numbers<[1], [0], [0], [1], [0, 0, 1, 1], [], []>} : vector<16x64xf32>, vector<64x128xf32>, vector<16x128xf32> -> vector<16x128xf32>
    %36 = arith.addf %30, %35 : vector<16x128xf32>
    %c1_43 = arith.constant 1 : index
    %c1_44 = arith.constant 1 : index
    %c0_45 = arith.constant 0 : index
    %37 = vector.load %arg5[%c1_43, %c1_44, %c0_45] : memref<4x18x64xf32, #tpu.memory_space<vmem>>, vector<1x16x64xf32>
    %38 = vector.shape_cast %37 : vector<1x16x64xf32> to vector<16x64xf32>
    %c1_46 = arith.constant 1 : index
    %c0_47 = arith.constant 0 : index
    %c0_48 = arith.constant 0 : index
    %39 = vector.load %arg2[%c1_46, %c0_47, %c0_48] : memref<3x64x128xf32, #tpu.memory_space<vmem>>, vector<1x64x128xf32>
    %40 = vector.shape_cast %39 : vector<1x64x128xf32> to vector<64x128xf32>
    %cst_49 = arith.constant dense<0.000000e+00> : vector<16x128xf32>
    %41 = tpu.matmul %38, %40, %cst_49 {dimension_numbers = #tpu.dot_dimension_numbers<[1], [0], [0], [1], [0, 0, 1, 1], [], []>} : vector<16x64xf32>, vector<64x128xf32>, vector<16x128xf32> -> vector<16x128xf32>
    %42 = arith.addf %36, %41 : vector<16x128xf32>
    %c1_50 = arith.constant 1 : index
    %c2_51 = arith.constant 2 : index
    %c0_52 = arith.constant 0 : index
    %43 = vector.load %arg5[%c1_50, %c2_51, %c0_52] : memref<4x18x64xf32, #tpu.memory_space<vmem>>, vector<1x16x64xf32>
    %44 = vector.shape_cast %43 : vector<1x16x64xf32> to vector<16x64xf32>
    %c2_53 = arith.constant 2 : index
    %c0_54 = arith.constant 0 : index
    %c0_55 = arith.constant 0 : index
    %45 = vector.load %arg2[%c2_53, %c0_54, %c0_55] : memref<3x64x128xf32, #tpu.memory_space<vmem>>, vector<1x64x128xf32>
    %46 = vector.shape_cast %45 : vector<1x64x128xf32> to vector<64x128xf32>
    %cst_56 = arith.constant dense<0.000000e+00> : vector<16x128xf32>
    %47 = tpu.matmul %44, %46, %cst_56 {dimension_numbers = #tpu.dot_dimension_numbers<[1], [0], [0], [1], [0, 0, 1, 1], [], []>} : vector<16x64xf32>, vector<64x128xf32>, vector<16x128xf32> -> vector<16x128xf32>
    %48 = arith.addf %42, %47 : vector<16x128xf32>
    %49 = vector.broadcast %5 : vector<1x128xf32> to vector<16x128xf32>
    %50 = arith.addf %48, %49 : vector<16x128xf32>
    %c1_57 = arith.constant 1 : index
    %c0_58 = arith.constant 0 : index
    %c0_59 = arith.constant 0 : index
    %51 = vector.load %arg4[%c1_57, %c0_58, %c0_59] : memref<4x16x128xf32, #tpu.memory_space<vmem>>, vector<1x16x128xf32>
    %52 = vector.shape_cast %51 : vector<1x16x128xf32> to vector<16x128xf32>
    %53 = vector.shape_cast %50 : vector<16x128xf32> to vector<1x16x128xf32>
    tpu.vector_store %arg4[%c1_57, %c0_58, %c0_59], %53 {strides = array<i32>} : memref<4x16x128xf32, #tpu.memory_space<vmem>>, vector<1x16x128xf32>,
    %cst_60 = arith.constant 0.000000e+00 : f32
    %54 = vector.broadcast %cst_60 : f32 to vector<16x128xf32>
    %c2_61 = arith.constant 2 : index
    %c0_62 = arith.constant 0 : index
    %c0_63 = arith.constant 0 : index
    %55 = vector.load %arg5[%c2_61, %c0_62, %c0_63] : memref<4x18x64xf32, #tpu.memory_space<vmem>>, vector<1x16x64xf32>
    %56 = vector.shape_cast %55 : vector<1x16x64xf32> to vector<16x64xf32>
    %c0_64 = arith.constant 0 : index
    %c0_65 = arith.constant 0 : index
    %c0_66 = arith.constant 0 : index
    %57 = vector.load %arg2[%c0_64, %c0_65, %c0_66] : memref<3x64x128xf32, #tpu.memory_space<vmem>>, vector<1x64x128xf32>
    %58 = vector.shape_cast %57 : vector<1x64x128xf32> to vector<64x128xf32>
    %cst_67 = arith.constant dense<0.000000e+00> : vector<16x128xf32>
    %59 = tpu.matmul %56, %58, %cst_67 {dimension_numbers = #tpu.dot_dimension_numbers<[1], [0], [0], [1], [0, 0, 1, 1], [], []>} : vector<16x64xf32>, vector<64x128xf32>, vector<16x128xf32> -> vector<16x128xf32>
    %60 = arith.addf %54, %59 : vector<16x128xf32>
    %c2_68 = arith.constant 2 : index
    %c1_69 = arith.constant 1 : index
    %c0_70 = arith.constant 0 : index
    %61 = vector.load %arg5[%c2_68, %c1_69, %c0_70] : memref<4x18x64xf32, #tpu.memory_space<vmem>>, vector<1x16x64xf32>
    %62 = vector.shape_cast %61 : vector<1x16x64xf32> to vector<16x64xf32>
    %c1_71 = arith.constant 1 : index
    %c0_72 = arith.constant 0 : index
    %c0_73 = arith.constant 0 : index
    %63 = vector.load %arg2[%c1_71, %c0_72, %c0_73] : memref<3x64x128xf32, #tpu.memory_space<vmem>>, vector<1x64x128xf32>
    %64 = vector.shape_cast %63 : vector<1x64x128xf32> to vector<64x128xf32>
    %cst_74 = arith.constant dense<0.000000e+00> : vector<16x128xf32>
    %65 = tpu.matmul %62, %64, %cst_74 {dimension_numbers = #tpu.dot_dimension_numbers<[1], [0], [0], [1], [0, 0, 1, 1], [], []>} : vector<16x64xf32>, vector<64x128xf32>, vector<16x128xf32> -> vector<16x128xf32>
    %66 = arith.addf %60, %65 : vector<16x128xf32>
    %c2_75 = arith.constant 2 : index
    %c2_76 = arith.constant 2 : index
    %c0_77 = arith.constant 0 : index
    %67 = vector.load %arg5[%c2_75, %c2_76, %c0_77] : memref<4x18x64xf32, #tpu.memory_space<vmem>>, vector<1x16x64xf32>
    %68 = vector.shape_cast %67 : vector<1x16x64xf32> to vector<16x64xf32>
    %c2_78 = arith.constant 2 : index
    %c0_79 = arith.constant 0 : index
    %c0_80 = arith.constant 0 : index
    %69 = vector.load %arg2[%c2_78, %c0_79, %c0_80] : memref<3x64x128xf32, #tpu.memory_space<vmem>>, vector<1x64x128xf32>
    %70 = vector.shape_cast %69 : vector<1x64x128xf32> to vector<64x128xf32>
    %cst_81 = arith.constant dense<0.000000e+00> : vector<16x128xf32>
    %71 = tpu.matmul %68, %70, %cst_81 {dimension_numbers = #tpu.dot_dimension_numbers<[1], [0], [0], [1], [0, 0, 1, 1], [], []>} : vector<16x64xf32>, vector<64x128xf32>, vector<16x128xf32> -> vector<16x128xf32>
    %72 = arith.addf %66, %71 : vector<16x128xf32>
    %73 = vector.broadcast %5 : vector<1x128xf32> to vector<16x128xf32>
    %74 = arith.addf %72, %73 : vector<16x128xf32>
    %c2_82 = arith.constant 2 : index
    %c0_83 = arith.constant 0 : index
    %c0_84 = arith.constant 0 : index
    %75 = vector.load %arg4[%c2_82, %c0_83, %c0_84] : memref<4x16x128xf32, #tpu.memory_space<vmem>>, vector<1x16x128xf32>
    %76 = vector.shape_cast %75 : vector<1x16x128xf32> to vector<16x128xf32>
    %77 = vector.shape_cast %74 : vector<16x128xf32> to vector<1x16x128xf32>
    tpu.vector_store %arg4[%c2_82, %c0_83, %c0_84], %77 {strides = array<i32>} : memref<4x16x128xf32, #tpu.memory_space<vmem>>, vector<1x16x128xf32>,
    %cst_85 = arith.constant 0.000000e+00 : f32
    %78 = vector.broadcast %cst_85 : f32 to vector<16x128xf32>
    %c3 = arith.constant 3 : index
    %c0_86 = arith.constant 0 : index
    %c0_87 = arith.constant 0 : index
    %79 = vector.load %arg5[%c3, %c0_86, %c0_87] : memref<4x18x64xf32, #tpu.memory_space<vmem>>, vector<1x16x64xf32>
    %80 = vector.shape_cast %79 : vector<1x16x64xf32> to vector<16x64xf32>
    %c0_88 = arith.constant 0 : index
    %c0_89 = arith.constant 0 : index
    %c0_90 = arith.constant 0 : index
    %81 = vector.load %arg2[%c0_88, %c0_89, %c0_90] : memref<3x64x128xf32, #tpu.memory_space<vmem>>, vector<1x64x128xf32>
    %82 = vector.shape_cast %81 : vector<1x64x128xf32> to vector<64x128xf32>
    %cst_91 = arith.constant dense<0.000000e+00> : vector<16x128xf32>
    %83 = tpu.matmul %80, %82, %cst_91 {dimension_numbers = #tpu.dot_dimension_numbers<[1], [0], [0], [1], [0, 0, 1, 1], [], []>} : vector<16x64xf32>, vector<64x128xf32>, vector<16x128xf32> -> vector<16x128xf32>
    %84 = arith.addf %78, %83 : vector<16x128xf32>
    %c3_92 = arith.constant 3 : index
    %c1_93 = arith.constant 1 : index
    %c0_94 = arith.constant 0 : index
    %85 = vector.load %arg5[%c3_92, %c1_93, %c0_94] : memref<4x18x64xf32, #tpu.memory_space<vmem>>, vector<1x16x64xf32>
    %86 = vector.shape_cast %85 : vector<1x16x64xf32> to vector<16x64xf32>
    %c1_95 = arith.constant 1 : index
    %c0_96 = arith.constant 0 : index
    %c0_97 = arith.constant 0 : index
    %87 = vector.load %arg2[%c1_95, %c0_96, %c0_97] : memref<3x64x128xf32, #tpu.memory_space<vmem>>, vector<1x64x128xf32>
    %88 = vector.shape_cast %87 : vector<1x64x128xf32> to vector<64x128xf32>
    %cst_98 = arith.constant dense<0.000000e+00> : vector<16x128xf32>
    %89 = tpu.matmul %86, %88, %cst_98 {dimension_numbers = #tpu.dot_dimension_numbers<[1], [0], [0], [1], [0, 0, 1, 1], [], []>} : vector<16x64xf32>, vector<64x128xf32>, vector<16x128xf32> -> vector<16x128xf32>
    %90 = arith.addf %84, %89 : vector<16x128xf32>
    %c3_99 = arith.constant 3 : index
    %c2_100 = arith.constant 2 : index
    %c0_101 = arith.constant 0 : index
    %91 = vector.load %arg5[%c3_99, %c2_100, %c0_101] : memref<4x18x64xf32, #tpu.memory_space<vmem>>, vector<1x16x64xf32>
    %92 = vector.shape_cast %91 : vector<1x16x64xf32> to vector<16x64xf32>
    %c2_102 = arith.constant 2 : index
    %c0_103 = arith.constant 0 : index
    %c0_104 = arith.constant 0 : index
    %93 = vector.load %arg2[%c2_102, %c0_103, %c0_104] : memref<3x64x128xf32, #tpu.memory_space<vmem>>, vector<1x64x128xf32>
    %94 = vector.shape_cast %93 : vector<1x64x128xf32> to vector<64x128xf32>
    %cst_105 = arith.constant dense<0.000000e+00> : vector<16x128xf32>
    %95 = tpu.matmul %92, %94, %cst_105 {dimension_numbers = #tpu.dot_dimension_numbers<[1], [0], [0], [1], [0, 0, 1, 1], [], []>} : vector<16x64xf32>, vector<64x128xf32>, vector<16x128xf32> -> vector<16x128xf32>
    %96 = arith.addf %90, %95 : vector<16x128xf32>
    %97 = vector.broadcast %5 : vector<1x128xf32> to vector<16x128xf32>
    %98 = arith.addf %96, %97 : vector<16x128xf32>
    %c3_106 = arith.constant 3 : index
    %c0_107 = arith.constant 0 : index
    %c0_108 = arith.constant 0 : index
    %99 = vector.load %arg4[%c3_106, %c0_107, %c0_108] : memref<4x16x128xf32, #tpu.memory_space<vmem>>, vector<1x16x128xf32>
    %100 = vector.shape_cast %99 : vector<1x16x128xf32> to vector<16x128xf32>
    %101 = vector.shape_cast %98 : vector<16x128xf32> to vector<1x16x128xf32>
    tpu.vector_store %arg4[%c3_106, %c0_107, %c0_108], %101 {strides = array<i32>} : memref<4x16x128xf32, #tpu.memory_space<vmem>>, vector<1x16x128xf32>,
    return
  }
  func.func @transform_0(%arg0: i32) -> (i32, i32, i32) {
    %c0_i32 = arith.constant 0 : i32
    %c0_i32_0 = arith.constant 0 : i32
    %c0_i32_1 = arith.constant 0 : i32
    return %arg0, %c0_i32, %c0_i32_0 : i32, i32, i32
  }
  func.func @transform_1(%arg0: i32) -> (i32, i32, i32) {
    %c0_i32 = arith.constant 0 : i32
    %c0_i32_0 = arith.constant 0 : i32
    %c0_i32_1 = arith.constant 0 : i32
    %c0_i32_2 = arith.constant 0 : i32
    return %c0_i32, %c0_i32_0, %c0_i32_1 : i32, i32, i32
  }
  func.func @transform_2(%arg0: i32) -> (i32, i32) {
    %c0_i32 = arith.constant 0 : i32
    %c0_i32_0 = arith.constant 0 : i32
    %c0_i32_1 = arith.constant 0 : i32
    return %c0_i32, %c0_i32_0 : i32, i32
  }
  func.func @transform_3(%arg0: i32) -> (i32, i32, i32) {
    %c0_i32 = arith.constant 0 : i32
    %c0_i32_0 = arith.constant 0 : i32
    %c0_i32_1 = arith.constant 0 : i32
    return %arg0, %c0_i32, %c0_i32_0 : i32, i32, i32
  }
}

</mosaic_0001>

<bundles_post_ra>
// kernel: tpu_custom_call.1
= control target key start
LH: loop header
LB: loop body
LE: loop exit
PB: predicated region body
PF: predicated region fallthrough
CT: control target
= control target key end

     0   :  { %8 = vsyncpa [#allocation4], 0  ;;  %s2667_s0 = inlined_call_operand.hbm [shape: f32[8,16,64], index: 0, kind: input, shape index: {}]   ;;  %s2668_s1 = inlined_call_operand.hbm [shape: f32[3,64,128], index: 1, kind: input, shape index: {}]   ;;  %s2669_s2 = inlined_call_operand.vmem [shape: f32[1,128], index: 2, kind: input, shape index: {}]   ;;  %s2670_s3 = inlined_call_operand.hbm [shape: f32[8,16,128], index: 3, kind: output, shape index: {}]  }
   0x1   :  { %10 = vsyncpa [#allocation4 + $0x1], 0 }
   0x2   :  { %11 = vsyncpa [#allocation7], 0 }
   0x3   :  { %12 = vsyncpa [#allocation5], 0 }
   0x4   :  { %14 = vsyncpa [#allocation5 + $0x1], 0  ;;  %s2291_s12 = smov 0   ;;  %s2293_s13 = smov 0  }
   0x5   :  { %s2295_s14 = smov 0   ;;  %s2297_s15 = smov 0  }
   0x6 LB: > { %s2312_s16 = sadd.s32 4294967295, %s2261_s15   ;;  %s1462_s17 = sadd.s32 4294967294, %s2261_s15   ;;  %s2261_s15 = sphi %s2297_s15, %s2690_s15   ;;  %s2257_s14 = sphi %s2295_s14, %s2689_s14   ;;  %s2253_s13 = sphi %s2293_s13, %s2688_s13   ;;  %s2249_s12 = sphi %s2291_s12, %s2687_s12  }
   0x7   : > { %p40_p0 = scmp.ne.s32.totalorder %s2253_s13, %s2249_s12  ;;  %p2671_p1 = scmp.eq.s32.totalorder %s2312_s16, 0 }
   0x8   : > { %p112_p3 = scmp.eq.s32.totalorder %s1462_s17, 1  ;;  %p1463_p5 = scmp.ge.s32.totalorder %s2261_s15, 1 }
   0x9   : > { %p2321_p4 = por %p2671_p1, %p40_p0  ;;  %p119_p7 = scmp.lt.s32.totalorder %s2261_s15, 3 }
   0xa   : > { %p2326_p6 = por %p112_p3, %p40_p0  ;;  %s2263_s21 = smov [#allocation6]  }
   0xb   : > { %s2674_s18 = scalar_select %p2321_p4, 1, 0 }
   0xc   : > { %s2675_s19 = scalar_select %p2326_p6, 1, 0 }
   0xd   : > { %p2331_p8 = pnand %p1463_p5, %p119_p7  ;;  %s131_s22 = sshll.u32 %s2263_s21, 4  ;;  %s2335_s22 = int_to_ptr.vmem [resolvable:$true] %s131_s22 }
   0xe   : > { %s2347_s24 = sadd.s32 1, %s2261_s15   ;;  %s27_s25 = sadd.s32 1, %s2257_s14 }
   0xf   : > { %s2676_s20 = scalar_select %p2331_p8, 1, 0 }
  0x10   : > { %p2079_p9 = pneg %p2331_p8  ;;  %s24_s26 = ssub.s32 %s2261_s15, %s2347_s24 }
  0x11   : > { %s2133_s29 = scalar_lea.hbm %s2668_s1, 3072 }
  0x12   : > { %p2342_p11 = pnand %p2079_p9, %p2671_p1  ;;  %p2134_p12 = scmp.ne.s32.totalorder %s2668_s1, %s2133_s29 }
  0x13   : > { %p2140_p5 = scmp.lt.u32.totalorder %s2133_s29, %s2668_s1 }
  0x14   : > { %p2135_p13 = pneg %p2342_p11 }
  0x16   : > { %p2136_p0 = pnand %p2135_p13, %p2134_p12 }
  0x18   : > { %p2137_p3 = pneg %p2136_p0 }
  0x1a   : > { %p2142_p7 = pnand %p2140_p5, %p2137_p3 }
  0x1c   : > { %2145 = shalt.err (!%p2142_p7)
}
  0x1d   : > { %s2146_s7 = scalar_lea.vmem %s2335_s22, 3072  ;;  %p2154_p2 = scmp.lt.s32.totalorder %s2335_s22, %s2335_s22 }
  0x1e   : > { %p2147_p9 = scmp.ne.s32.totalorder %s2335_s22, %s2146_s7  ;;  %p2155_p6 = scmp.lt.s32.totalorder %s2146_s7, %s2146_s7 }
  0x20   : > { %p2149_p10 = pnand %p2147_p9, %p2135_p13  ;;  %p2156_p4 = por %p2155_p6, %p2154_p2 }
  0x22   : > { %p2150_p1 = pneg %p2149_p10 }
  0x24   : > { %p2157_p8 = pnand %p2156_p4, %p2150_p1 }
  0x26   : > { %2160 = shalt.err (!%p2157_p8)
}
  0x27   : > { %s2264_s8 = smov 128   ;;  %s2265_s9 = smov 8  }
  0x28   : > { %2082 = dma.hbm_to_vmem [thread:$0]  (!%p2342_p11), %s2668_s1, 3072, %s2335_s22, [#allocation7], %s2264_s8, %s2264_s8, %s2265_s9  }
  0x29   : > { %p25_p1 = scmp.eq.s32.totalorder %s24_s26, 0  ;;  %p34_p2 = scmp.ne.s32.totalorder %s2257_s14, %s2253_s13 }
  0x2a   : > { %p35_p4 = scmp.eq.s32.totalorder %s2261_s15, 0  ;;  %p2092_p6 = scmp.lt.s32.totalorder %s2261_s15, 2 }
  0x2b   : > { %s2381_s17 = scalar_select %p25_p1, %s2257_s14, %s27_s25  }
  0x2c   : > { %p36_p8 = por %p35_p4, %p34_p2  ;;  %p2678_p10 = scmp.eq.s32.totalorder %s2312_s16, 1 }
  0x2d   : > { %s148_s23 = sand.u32 1, %s2257_s14   ;;  %s1512_s27 = sshll.u32 %s2261_s15, 10 }
  0x2e   : > { %p2385_p12 = por %p2678_p10, %p34_p2  ;;  %s1466_s28 = sshll.u32 %s148_s23, 6 }
  0x2f   : > { %s2394_s4 = scalar_lea.hbm %s2667_s0, %s1512_s27  ;;  %s152_s22 = scalar_lea.vmem [#allocation3], %s1466_s28 }
  0x30   : > { %s160_s25 = sshll.u32 %s152_s22, 4  ;;  %p2396_p11 = pnand %p2092_p6, %p36_p8  ;;  %s2400_s25 = int_to_ptr.vmem [resolvable:$true] %s160_s25 }
  0x31   : > { %s2402_s5 = scalar_lea.sflag [#allocation4], %s148_s23  ;;  %s2161_s6 = scalar_lea.hbm %s2394_s4, 1024 }
  0x32   : > { %p2162_p13 = scmp.ne.s32.totalorder %s2394_s4, %s2161_s6  ;;  %p2163_p0 = pneg %p2396_p11 }
  0x33   : > { %s2166_s11 = scalar_lea.hbm %s2667_s0, 2048  ;;  %p2167_p7 = scmp.lt.u32.totalorder %s2394_s4, %s2667_s0 }
  0x34   : > { %p2164_p3 = pnand %p2163_p0, %p2162_p13  ;;  %p2168_p9 = scmp.lt.u32.totalorder %s2166_s11, %s2161_s6 }
  0x35   : > { %p2170_p2 = scmp.lt.u32.totalorder %s2161_s6, %s2394_s4 }
  0x36   : > { %p2165_p5 = pneg %p2164_p3  ;;  %p2169_p1 = por %p2168_p9, %p2167_p7 }
  0x38   : > { %p2171_p4 = por %p2170_p2, %p2169_p1 }
  0x3a   : > { %p2172_p6 = pnand %p2171_p4, %p2165_p5 }
  0x3c   : > { %2175 = shalt.err (!%p2172_p6)
}
  0x3d   : > { %s2176_s23 = scalar_lea.vmem %s2400_s25, 1024  ;;  %s2266_s29 = smov [#allocation3]  }
  0x3e   : > { %p2177_p8 = scmp.ne.s32.totalorder %s2400_s25, %s2176_s23  ;;  %s2181_s30 = sshll.u32 %s2266_s29, 4  ;;  %s2182_s30 = int_to_ptr.vmem [resolvable:$false] %s2181_s30 }
  0x3f   : > { %s2183_s22 = scalar_lea.vmem %s2182_s30, 2048  ;;  %p2184_p3 = scmp.lt.s32.totalorder %s2400_s25, %s2182_s30 }
  0x40   : > { %p2179_p10 = pnand %p2177_p8, %p2163_p0  ;;  %p2185_p7 = scmp.lt.s32.totalorder %s2183_s22, %s2176_s23 }
  0x42   : > { %p2180_p13 = pneg %p2179_p10  ;;  %p2186_p9 = por %p2185_p7, %p2184_p3 }
  0x44   : > { %p2187_p1 = pnand %p2186_p9, %p2180_p13 }
  0x46   : > { %2190 = shalt.err (!%p2187_p1)
}
  0x47   : > { %2086 = dma.hbm_to_vmem [thread:$0]  (!%p2396_p11), %s2394_s4, 1024, %s2400_s25, %s2402_s5, %s2264_s8, %s2264_s8, %s2265_s9  }
  0x48   : > { %p2681_p0 = scmp.ne.s32.totalorder %s2676_s20, 0 }
  0x49   : > { %s2436_s6 = sand.u32 (!%p2681_p0), 1, %s2253_s13   ;;  %p2682_p5 = scmp.ne.s32.totalorder (!%p2681_p0), %s2674_s18, 0 }
  0x4a   : > { %172 = sbr.rel (%p2681_p0) target bundleno = 414 (0x19e), region = 32  ;;  %s1471_s7 = sshll.u32 (!%p2681_p0), %s2436_s6, 6 }
  0x4b   : > { %s175_s10 = scalar_lea.sflag (!%p2681_p0), [#allocation4], %s2436_s6  ;;  %s2442_s26 = scalar_lea.vmem (!%p2681_p0), [#allocation3], %s1471_s7 }
  0x51   : > { %2236 = dma.done.wait (%p2682_p5), %s175_s10, 1024  }
  0x52   : > { %2238 = vsyncadd (%p2682_p5), %s175_s10, 4294966272  ;;  %p2683_p11 = scmp.eq.s32.totalorder %s2312_s16, 0 }
  0x54   : > { %2240 = dma.done.wait (%p2683_p11), [#allocation7], 3072   ;;  %p2684_p2 = pmov %p2683_p11 }
  0x55   : > { %vm207_vm0 = vcmask 516096   ;;  %v2267_v0 = vmov 0.0   ;;  %v247_v1 = vld [vmem:[#allocation6 + $0x40] sm:$0xff]  ;;  %v248_v2 = vld [vmem:[#allocation6 + $0x48] sm:$0xff]  ;;  %v249_v3 = vld [vmem:[#allocation6 + $0x50] sm:$0xff]  ;;  %vm224_vm1 = vcmask 523264  }
  0x56   : > { %2242 = vsyncadd (%p2684_p2), [#allocation7], 4294964224  ;;  %208 = vst.msk [vmem:[#allocation2] sm:$0x1] %vm207_vm0, %v2267_v0  ;;  %v2452_v4 = vpack.c.bf16 %v248_v2, %v247_v1  ;;  %v250_v5 = vld [vmem:[#allocation6 + $0x58] sm:$0xff]  ;;  %v251_v7 = vld [vmem:[#allocation6 + $0x60] sm:$0xff] }
  0x57   : > { %209 = vst.msk [vmem:[#allocation2 + $0x18] sm:$0x1] %vm207_vm0, %v2267_v0  ;;  %210 = vst.msk [vmem:[#allocation2 + $0x30] sm:$0x1] %vm207_vm0, %v2267_v0  ;;  %v2454_v6 = vpack.c.bf16 %v250_v5, %v249_v3  ;;  %v252_v8 = vld [vmem:[#allocation6 + $0x68] sm:$0xff]  ;;  %v216_v9 = vld [vmem:[%s2442_s26] sm:$0xff] }
  0x58   : > { %211 = vst.msk [vmem:[#allocation2 + $0x48] sm:$0x1] %vm207_vm0, %v2267_v0  ;;  %212 = vst.msk [vmem:[#allocation2 + $0x11] sm:$0x1] %vm207_vm0, %v2267_v0  ;;  %1864 = vmatprep.subr.bf16.mxu0 %v2452_v4  ;;  %1912 = vmatprep.subr.bf16.mxu1 %v2452_v4  ;;  %v218_v10 = vld [vmem:[%s2442_s26 + $0x10] sm:$0xff]  ;;  %v217_v11 = vld [vmem:[%s2442_s26 + $0x8] sm:$0xff]  ;;  %v2468_v13 = vpack.c.bf16 %v252_v8, %v251_v7 }
  0x59   : > { %213 = vst.msk [vmem:[#allocation2 + $0x29] sm:$0x1] %vm207_vm0, %v2267_v0  ;;  %214 = vst.msk [vmem:[#allocation2 + $0x41] sm:$0x1] %vm207_vm0, %v2267_v0  ;;  %1866 = vmatpush3.bf16.msra.mxu0 %v2452_v4  ;;  %1914 = vmatpush3.bf16.msra.mxu1 %v2452_v4  ;;  %v219_v12 = vld [vmem:[%s2442_s26 + $0x18] sm:$0xff]  ;;  %v253_v14 = vld [vmem:[#allocation6 + $0x70] sm:$0xff] }
  0x5a   : > { %215 = vst.msk [vmem:[#allocation2 + $0x59] sm:$0x1] %vm207_vm0, %v2267_v0  ;;  %1868 = vmatprep.subr.bf16.mxu0 %v2454_v6  ;;  %1916 = vmatprep.subr.bf16.mxu1 %v2454_v6  ;;  %v254_v15 = vld [vmem:[#allocation6 + $0x78] sm:$0xff]  ;;  %v236_v17 = vld [vmem:[#allocation6] sm:$0xff]  ;;  %v222_v19 = vld [vmem:[%s2442_s26 + $0x30] sm:$0xff]  ;;  %s204_s8 = scalar_lea.vmem [#allocation8], %s1471_s7 }
  0x5b   : > { %225 = vst.msk [vmem:[#allocation2 + $0x1] sm:$0xff] %vm224_vm1, %v216_v9  ;;  %227 = vst.msk [vmem:[#allocation2 + $0x19] sm:$0xff] %vm224_vm1, %v218_v10  ;;  %v2476_v16 = vpack.c.bf16 %v254_v15, %v253_v14  ;;  %v220_v18 = vld [vmem:[%s2442_s26 + $0x20] sm:$0xff]  ;;  %v237_v21 = vld [vmem:[#allocation6 + $0x8] sm:$0xff]  ;;  %s1379_s9 = sshll.u32 %s204_s8, 4  ;;  %s1514_s4 = sshll.u32 %s2312_s16, 10  ;;  %s2618_s9 = int_to_ptr.vmem [resolvable:$true] %s1379_s9 }
  0x5c   : > { %226 = vst.msk [vmem:[#allocation2 + $0x9] sm:$0xff] %vm224_vm1, %v217_v11  ;;  %228 = vst.msk [vmem:[#allocation2 + $0x21] sm:$0xff] %vm224_vm1, %v219_v12  ;;  %v221_v22 = vld [vmem:[%s2442_s26 + $0x28] sm:$0xff]  ;;  %v223_v24 = vld [vmem:[%s2442_s26 + $0x38] sm:$0xff]  ;;  %v2491_v25 = vpack.c.bf16 %v237_v21, %v236_v17  ;;  %s2623_s11 = scalar_lea.hbm %s2670_s3, %s1514_s4  ;;  %s1365_s16 = scalar_lea.sflag [#allocation5], %s2436_s6 }
  0x5d   : > { %1870 = vmatpush3.bf16.msra.mxu0 %v2454_v6  ;;  %1918 = vmatpush3.bf16.msra.mxu1 %v2454_v6  ;;  %229 = vst.msk [vmem:[#allocation2 + $0x31] sm:$0xff] %vm224_vm1, %v220_v18  ;;  %231 = vst.msk [vmem:[#allocation2 + $0x49] sm:$0xff] %vm224_vm1, %v222_v19  ;;  %v238_v26 = vld [vmem:[#allocation6 + $0x10] sm:$0xff]  ;;  %v239_v27 = vld [vmem:[#allocation6 + $0x18] sm:$0xff]  ;;  %s2191_s27 = scalar_lea.vmem %s2618_s9, 1024  ;;  %s2268_s28 = smov [#allocation8]  }
  0x5e   : > { %1872 = vmatprep.subr.bf16.mxu0 %v2468_v13  ;;  %1920 = vmatprep.subr.bf16.mxu1 %v2468_v13  ;;  %230 = vst.msk [vmem:[#allocation2 + $0x39] sm:$0xff] %vm224_vm1, %v221_v22  ;;  %232 = vst.msk [vmem:[#allocation2 + $0x51] sm:$0xff] %vm224_vm1, %v223_v24  ;;  %v2498_v30 = vpack.c.bf16 %v239_v27, %v238_v26  ;;  %v240_v31 = vld [vmem:[#allocation6 + $0x20] sm:$0xff]  ;;  %v241_v32 = vld [vmem:[#allocation6 + $0x28] sm:$0xff]  ;;  %p2192_p4 = scmp.ne.s32.totalorder %s2618_s9, %s2191_s27  ;;  %s2195_s23 = sshll.u32 %s2268_s28, 4  ;;  %s2196_s23 = int_to_ptr.vmem [resolvable:$false] %s2195_s23 }
  0x5f   : > { %v2506_v35 = vpack.c.bf16 %v241_v32, %v240_v31  ;;  %v242_v36 = vld [vmem:[#allocation6 + $0x30] sm:$0xff]  ;;  %v243_v37 = vld [vmem:[#allocation6 + $0x38] sm:$0xff]  ;;  %v420_v39 = vld [vmem:[#allocation6 + $0x80] sm:$0xff]  ;;  %s2197_s29 = scalar_lea.vmem %s2196_s23, 2048  ;;  %p2198_p10 = scmp.lt.s32.totalorder %s2618_s9, %s2196_s23 }
  0x60   : > { %v2514_v38 = vpack.c.bf16 %v243_v37, %v242_v36  ;;  %v421_v40 = vld [vmem:[#allocation6 + $0x88] sm:$0xff]  ;;  %v422_v42 = vld [vmem:[#allocation6 + $0x90] sm:$0xff]  ;;  %v423_v43 = vld [vmem:[#allocation6 + $0x98] sm:$0xff]  ;;  %p2193_p6 = pnand %p2192_p4, %p2385_p12  ;;  %p2199_p13 = scmp.lt.s32.totalorder %s2197_s29, %s2191_s27 }
  0x61   : > { %1874 = vmatpush3.bf16.msra.mxu0 %v2468_v13  ;;  %1922 = vmatpush3.bf16.msra.mxu1 %v2468_v13  ;;  %v2520_v41 = vpack.c.bf16 %v421_v40, %v420_v39  ;;  %v2526_v46 = vpack.c.bf16 %v423_v43, %v422_v42  ;;  %v424_v47 = vld [vmem:[#allocation6 + $0xa0] sm:$0xff]  ;;  %v425_v48 = vld [vmem:[#allocation6 + $0xa8] sm:$0xff]  ;;  %v426_v52 = vld [vmem:[#allocation6 + $0xb0] sm:$0xff] }
  0x62   : > { %v244_v20 = vld [vmem:[#allocation2 + $0x1] sm:$0xff]  ;;  %v532_v23 = vld [vmem:[#allocation2 + $0x19] sm:$0xff]  ;;  %1876 = vmatprep.subr.bf16.mxu0 %v2476_v16  ;;  %1924 = vmatprep.subr.bf16.mxu1 %v2476_v16  ;;  %v2534_v51 = vpack.c.bf16 %v425_v48, %v424_v47  ;;  %p2194_p8 = pneg %p2193_p6  ;;  %p2200_p3 = por %p2199_p13, %p2198_p10 }
  0x63   : > { %1651 = vmatprep.mubr.msk.f32.mxu0 %vm224_vm1, %v244_v20  ;;  %1708 = vmatprep.mubr.msk.f32.mxu1 %vm224_vm1, %v532_v23  ;;  %v245_v28 = vld [vmem:[#allocation2 + $0x9] sm:$0xff]  ;;  %v533_v29 = vld [vmem:[#allocation2 + $0x21] sm:$0xff]  ;;  %v522_v34 = vld [vmem:[#allocation2 + $0x18] sm:$0xff] }
  0x64   : > { %v234_v33 = vld [vmem:[#allocation2] sm:$0xff]  ;;  %v235_v44 = vld [vmem:[#allocation2 + $0x8] sm:$0xff]  ;;  %v427_v53 = vld [vmem:[#allocation6 + $0xb8] sm:$0xff]  ;;  %p2201_p7 = pnand %p2200_p3, %p2194_p8 }
  0x65   : > { %1878 = vmatpush3.bf16.msra.mxu0 %v2476_v16  ;;  %1926 = vmatpush3.bf16.msra.mxu1 %v2476_v16  ;;  %v523_v45 = vld [vmem:[#allocation2 + $0x20] sm:$0xff]  ;;  %v2542_v54 = vpack.c.bf16 %v427_v53, %v426_v52  ;;  %v418_v55 = vld [vmem:[#allocation2 + $0xa] sm:$0xff]  ;;  %v804_v63 = vld [vmem:[#allocation2 + $0x38] sm:$0xff] }
  0x66   : > { %1880 = vmatprep.subr.bf16.mxu0 %v2491_v25  ;;  %1928 = vmatprep.subr.bf16.mxu1 %v2491_v25  ;;  %v417_v49 = vld [vmem:[#allocation2 + $0x2] sm:$0xff]  ;;  %v704_v50 = vld [vmem:[#allocation2 + $0x1a] sm:$0xff]  ;;  %v813_v57 = vld [vmem:[#allocation2 + $0x31] sm:$0xff] }
  0x67   : > { %v705_v56 = vld [vmem:[#allocation2 + $0x22] sm:$0xff]  ;;  %v814_v59 = vld [vmem:[#allocation2 + $0x39] sm:$0xff]  ;;  %v1095_v60 = vld [vmem:[#allocation2 + $0x51] sm:$0xff] }
  0x68   : > { %1652 = vmatmul.mubr.msk.f32.vlgmr.msra.gmra.mrb[0].mxu0 %vm224_vm1, %v245_v28  ;;  %1709 = vmatmul.mubr.msk.f32.vlgmr.msra.gmra.mrb[0].mxu1 %vm224_vm1, %v533_v29  ;;  %v1094_v58 = vld [vmem:[#allocation2 + $0x49] sm:$0xff]  ;;  %v985_v1 = vld [vmem:[#allocation2 + $0x32] sm:$0xff]  ;;  %v986_v3 = vld [vmem:[#allocation2 + $0x3a] sm:$0xff] }
  0x69   : > { %1882 = vmatpush3.bf16.msra.mxu0 %v2491_v25  ;;  %1930 = vmatpush3.bf16.msra.mxu1 %v2491_v25  ;;  %v803_v61 = vld [vmem:[#allocation2 + $0x30] sm:$0xff]  ;;  %v1084_v62 = vld [vmem:[#allocation2 + $0x48] sm:$0xff]  ;;  %v1480_v5 = vld [vmem:[%s2669_s2] ss:$0 sm:$0xff] }
  0x6a   : > { %1884 = vmatprep.subr.bf16.mxu0 %v2498_v30  ;;  %1932 = vmatprep.subr.bf16.mxu1 %v2498_v30  ;;  %v1085_v0 = vld [vmem:[#allocation2 + $0x50] sm:$0xff] }
  0x6b   : > { %1670 = vmatprep.mubr.msk.f32.mxu0 %vm224_vm1, %v234_v33  ;;  %1727 = vmatprep.mubr.msk.f32.mxu1 %vm224_vm1, %v522_v34  ;;  %v1266_v2 = vld [vmem:[#allocation2 + $0x4a] sm:$0xff] }
  0x6d   : > { %1886 = vmatpush3.bf16.msra.mxu0 %v2498_v30  ;;  %1934 = vmatpush3.bf16.msra.mxu1 %v2498_v30 }
  0x6e   : > { %1888 = vmatprep.subr.bf16.mxu0 %v2506_v35  ;;  %1936 = vmatprep.subr.bf16.mxu1 %v2506_v35 }
  0x71   : > { %1890 = vmatpush3.bf16.msra.mxu0 %v2506_v35  ;;  %1938 = vmatpush3.bf16.msra.mxu1 %v2506_v35 }
  0x72   : > { %1892 = vmatprep.subr.bf16.mxu0 %v2514_v38  ;;  %1940 = vmatprep.subr.bf16.mxu1 %v2514_v38 }
  0x75   : > { %1894 = vmatpush3.bf16.msra.mxu0 %v2514_v38  ;;  %1942 = vmatpush3.bf16.msra.mxu1 %v2514_v38 }
  0x76   : > { %1896 = vmatprep.subr.bf16.mxu0 %v2520_v41  ;;  %1944 = vmatprep.subr.bf16.mxu1 %v2520_v41 }
  0x78   : > { %1671 = vmatmul.mubr.msk.f32.vlgmr.msra.gmra.mrb[0].mxu0 %vm224_vm1, %v235_v44  ;;  %1728 = vmatmul.mubr.msk.f32.vlgmr.msra.gmra.mrb[0].mxu1 %vm224_vm1, %v523_v45 }
  0x79   : > { %1898 = vmatpush3.bf16.msra.mxu0 %v2520_v41  ;;  %1946 = vmatpush3.bf16.msra.mxu1 %v2520_v41 }
  0x7a   : > { %1900 = vmatprep.subr.bf16.mxu0 %v2526_v46  ;;  %1948 = vmatprep.subr.bf16.mxu1 %v2526_v46 }
  0x7b   : > { %1689 = vmatprep.mubr.msk.f32.mxu0 %vm224_vm1, %v417_v49  ;;  %1746 = vmatprep.mubr.msk.f32.mxu1 %vm224_vm1, %v704_v50 }
  0x7d   : > { %1902 = vmatpush3.bf16.msra.mxu0 %v2526_v46  ;;  %1950 = vmatpush3.bf16.msra.mxu1 %v2526_v46 }
  0x7e   : > { %1904 = vmatprep.subr.bf16.mxu0 %v2534_v51  ;;  %1952 = vmatprep.subr.bf16.mxu1 %v2534_v51 }
  0x81   : > { %1906 = vmatpush3.bf16.msra.mxu0 %v2534_v51  ;;  %1954 = vmatpush3.bf16.msra.mxu1 %v2534_v51 }
  0x82   : > { %1908 = vmatprep.subr.bf16.mxu0 %v2542_v54  ;;  %1956 = vmatprep.subr.bf16.mxu1 %v2542_v54 }
  0x85   : > { %1910 = vmatpush3.bf16.msra.mxu0 %v2542_v54  ;;  %1958 = vmatpush3.bf16.msra.mxu1 %v2542_v54 }
  0x86   : > { %1960 = vmatprep.subr.bf16.mxu0 %v2452_v4  ;;  %2008 = vmatprep.subr.bf16.mxu1 %v2452_v4 }
  0x88   : > { %1690 = vmatmul.mubr.msk.f32.vlgmr.msra.gmra.mrb[0].mxu0 %vm224_vm1, %v418_v55  ;;  %1747 = vmatmul.mubr.msk.f32.vlgmr.msra.gmra.mrb[0].mxu1 %vm224_vm1, %v705_v56 }
  0x89   : > { %1962 = vmatpush3.bf16.msra.mxu0 %v2452_v4  ;;  %2010 = vmatpush3.bf16.msra.mxu1 %v2452_v4  ;;  %v1267_v4 = vld [vmem:[#allocation2 + $0x52] sm:$0xff] }
  0x8a   : > { %1964 = vmatprep.subr.bf16.mxu0 %v2454_v6  ;;  %2012 = vmatprep.subr.bf16.mxu1 %v2454_v6 }
  0x8b   : > { %1765 = vmatprep.mubr.msk.f32.mxu0 %vm224_vm1, %v813_v57  ;;  %1822 = vmatprep.mubr.msk.f32.mxu1 %vm224_vm1, %v1094_v58 }
  0x8d   : > { %1966 = vmatpush3.bf16.msra.mxu0 %v2454_v6  ;;  %2014 = vmatpush3.bf16.msra.mxu1 %v2454_v6 }
  0x8e   : > { %1968 = vmatprep.subr.bf16.mxu0 %v2468_v13  ;;  %2016 = vmatprep.subr.bf16.mxu1 %v2468_v13 }
  0x91   : > { %1970 = vmatpush3.bf16.msra.mxu0 %v2468_v13  ;;  %2018 = vmatpush3.bf16.msra.mxu1 %v2468_v13 }
  0x92   : > { %1972 = vmatprep.subr.bf16.mxu0 %v2476_v16  ;;  %2020 = vmatprep.subr.bf16.mxu1 %v2476_v16 }
  0x95   : > { %1974 = vmatpush3.bf16.msra.mxu0 %v2476_v16  ;;  %2022 = vmatpush3.bf16.msra.mxu1 %v2476_v16 }
  0x96   : > { %1976 = vmatprep.subr.bf16.mxu0 %v2491_v25  ;;  %2024 = vmatprep.subr.bf16.mxu1 %v2491_v25 }
  0x98   : > { %1766 = vmatmul.mubr.msk.f32.vlgmr.msra.gmra.mrb[2].mxu0 %vm224_vm1, %v814_v59  ;;  %1823 = vmatmul.mubr.msk.f32.vlgmr.msra.gmra.mrb[2].mxu1 %vm224_vm1, %v1095_v60 }
  0x99   : > { %1978 = vmatpush3.bf16.msra.mxu0 %v2491_v25  ;;  %2026 = vmatpush3.bf16.msra.mxu1 %v2491_v25 }
  0x9a   : > { %1980 = vmatprep.subr.bf16.mxu0 %v2498_v30  ;;  %2028 = vmatprep.subr.bf16.mxu1 %v2498_v30 }
  0x9b   : > { %1784 = vmatprep.mubr.msk.f32.mxu0 %vm224_vm1, %v803_v61  ;;  %1841 = vmatprep.mubr.msk.f32.mxu1 %vm224_vm1, %v1084_v62 }
  0x9d   : > { %1982 = vmatpush3.bf16.msra.mxu0 %v2498_v30  ;;  %2030 = vmatpush3.bf16.msra.mxu1 %v2498_v30 }
  0x9e   : > { %1984 = vmatprep.subr.bf16.mxu0 %v2506_v35  ;;  %2032 = vmatprep.subr.bf16.mxu1 %v2506_v35 }
  0xa1   : > { %1986 = vmatpush3.bf16.msra.mxu0 %v2506_v35  ;;  %2034 = vmatpush3.bf16.msra.mxu1 %v2506_v35 }
  0xa2   : > { %1988 = vmatprep.subr.bf16.mxu0 %v2514_v38  ;;  %2036 = vmatprep.subr.bf16.mxu1 %v2514_v38 }
  0xa5   : > { %1990 = vmatpush3.bf16.msra.mxu0 %v2514_v38  ;;  %2038 = vmatpush3.bf16.msra.mxu1 %v2514_v38 }
  0xa6   : > { %1992 = vmatprep.subr.bf16.mxu0 %v2520_v41  ;;  %2040 = vmatprep.subr.bf16.mxu1 %v2520_v41 }
  0xa8   : > { %1785 = vmatmul.mubr.msk.f32.vlgmr.msra.gmra.mrb[2].mxu0 %vm224_vm1, %v804_v63  ;;  %1842 = vmatmul.mubr.msk.f32.vlgmr.msra.gmra.mrb[2].mxu1 %vm224_vm1, %v1085_v0 }
  0xa9   : > { %1994 = vmatpush3.bf16.msra.mxu0 %v2520_v41  ;;  %2042 = vmatpush3.bf16.msra.mxu1 %v2520_v41 }
  0xaa   : > { %1996 = vmatprep.subr.bf16.mxu0 %v2526_v46  ;;  %2044 = vmatprep.subr.bf16.mxu1 %v2526_v46 }
  0xab   : > { %1803 = vmatprep.mubr.msk.f32.mxu0 %vm224_vm1, %v985_v1  ;;  %1860 = vmatprep.mubr.msk.f32.mxu1 %vm224_vm1, %v1266_v2 }
  0xad   : > { %1998 = vmatpush3.bf16.msra.mxu0 %v2526_v46  ;;  %2046 = vmatpush3.bf16.msra.mxu1 %v2526_v46 }
  0xae   : > { %2000 = vmatprep.subr.bf16.mxu0 %v2534_v51  ;;  %2048 = vmatprep.subr.bf16.mxu1 %v2534_v51 }
  0xb1   : > { %2002 = vmatpush3.bf16.msra.mxu0 %v2534_v51  ;;  %2050 = vmatpush3.bf16.msra.mxu1 %v2534_v51 }
  0xb2   : > { %2004 = vmatprep.subr.bf16.mxu0 %v2542_v54  ;;  %2052 = vmatprep.subr.bf16.mxu1 %v2542_v54 }
  0xb5   : > { %2006 = vmatpush3.bf16.msra.mxu0 %v2542_v54  ;;  %2054 = vmatpush3.bf16.msra.mxu1 %v2542_v54 }
  0xb8   : > { %1804 = vmatmul.mubr.msk.f32.vlgmr.msra.gmra.mrb[2].mxu0 %vm224_vm1, %v986_v3  ;;  %1861 = vmatmul.mubr.msk.f32.vlgmr.msra.gmra.mrb[2].mxu1 %vm224_vm1, %v1267_v4 }
 0x15b   : > { %v1691_v6 = vpop.f32.mrb[0].mxu0  ;;  %v1748_v7 = vpop.f32.mrb[0].mxu1 }
 0x15c   : > { %v518_v8 = vadd.f32 %v1691_v6, %v1480_v5  ;;  %v798_v9 = vadd.f32 %v1748_v7, %v1480_v5  ;;  %v500_v10 = vpop.f32.mrb[1].mxu0  ;;  %v786_v11 = vpop.f32.mrb[1].mxu1 }
 0x15d   : > { %v517_v12 = vadd.f32 %v1480_v5, %v500_v10  ;;  %v797_v13 = vadd.f32 %v1480_v5, %v786_v11 }
 0x15e   : > { %520 = vst [vmem:[%s204_s8 + $0x8] sm:$0xff] %v518_v8  ;;  %1488 = vst [vmem:[%s204_s8 + $0x18] sm:$0xff] %v798_v9 }
 0x15f   : > { %519 = vst [vmem:[%s204_s8] sm:$0xff] %v517_v12  ;;  %1487 = vst [vmem:[%s204_s8 + $0x10] sm:$0xff] %v797_v13 }
 0x18b   : > { %v1805_v14 = vpop.f32.mrb[2].mxu0  ;;  %v1862_v15 = vpop.f32.mrb[2].mxu1 }
 0x18c   : > { %v1079_v16 = vadd.f32 %v1805_v14, %v1480_v5  ;;  %v1360_v17 = vadd.f32 %v1862_v15, %v1480_v5  ;;  %v1067_v18 = vpop.f32.mrb[3].mxu0  ;;  %v1348_v19 = vpop.f32.mrb[3].mxu1 }
 0x18d   : > { %v1078_v20 = vadd.f32 %v1480_v5, %v1067_v18  ;;  %v1359_v21 = vadd.f32 %v1480_v5, %v1348_v19 }
 0x18e   : > { %1496 = vst [vmem:[%s204_s8 + $0x28] sm:$0xff] %v1079_v16  ;;  %1504 = vst [vmem:[%s204_s8 + $0x38] sm:$0xff] %v1360_v17 }
 0x18f   : > { %1495 = vst [vmem:[%s204_s8 + $0x20] sm:$0xff] %v1078_v20  ;;  %1503 = vst [vmem:[%s204_s8 + $0x30] sm:$0xff] %v1359_v21 }
 0x190   : > { %2204 = shalt.err (!%p2201_p7)
}
 0x191   : > { %s2205_s30 = scalar_lea.hbm %s2623_s11, 1024  ;;  %s2209_s10 = scalar_lea.hbm %s2670_s3, 2048 }
 0x192   : > { %p2206_p9 = scmp.ne.s32.totalorder %s2623_s11, %s2205_s30  ;;  %p2210_p5 = scmp.lt.u32.totalorder %s2623_s11, %s2670_s3 }
 0x193   : > { %p2211_p11 = scmp.lt.u32.totalorder %s2209_s10, %s2205_s30  ;;  %p2213_p4 = scmp.lt.u32.totalorder %s2205_s30, %s2623_s11 }
 0x194   : > { %p2207_p1 = pnand %p2206_p9, %p2385_p12 }
 0x195   : > { %p2212_p2 = por %p2211_p11, %p2210_p5 }
 0x196   : > { %p2208_p0 = pneg %p2207_p1 }
 0x197   : > { %p2214_p6 = por %p2213_p4, %p2212_p2 }
 0x199   : > { %p2215_p8 = pnand %p2214_p6, %p2208_p0 }
 0x19b   : > { %2218 = shalt.err (!%p2215_p8)
}
 0x19c   : > { %s2269_s20 = smov 128   ;;  %s2270_s8 = smov 8  }
 0x19d   : > { %2077 = dma.vmem_to_hbm [thread:$0]  (%p2385_p12), %s2618_s9, 1024, %s2623_s11, %s1365_s16, %s2269_s20, %s2269_s20, %s2270_s8  }
 0x19e PF: > { %s1394_s4 = sand.u32 1, %s2249_s12   ;;  %p2685_p10 = scmp.ne.s32.totalorder %s2675_s19, 0 }
 0x19f   : > { %p2686_p13 = scmp.ge.s32.totalorder %s2261_s15, 2  ;;  %s1395_s25 = scalar_lea.sflag [#allocation5], %s1394_s4 }
 0x1a1   : > { %p2088_p3 = pnand %p2686_p13, %p2685_p10 }
 0x1a3   : > { %2244 = dma.done.wait (!%p2088_p3), %s1395_s25, 1024  }
 0x1a4   : > { %2246 = vsyncadd (!%p2088_p3), %s1395_s25, 4294966272  ;;  %p17_p7 = scmp.ge.s32.totalorder %s2347_s24, 4   ;;  %s2687_s12 = smov %s2253_s13 }
 0x1a5   : > { %s2688_s13 = smov %s2257_s14  ;;  %s2689_s14 = smov %s2381_s17 }
 0x1a6   : > { %s2690_s15 = smov %s2347_s24  ;;  %19 = sbr.rel (!%p17_p7) target bundleno = 6 (0x6), region = 89 }
 0x1ad   :  { %1400 = vsyncpa [#allocation4], 1 }
 0x1ae   :  { %1402 = vsyncpa [#allocation4 + $0x1], 1 }
 0x1af   :  { %1403 = vsyncpa [#allocation7], 1 }
 0x1b0   :  { %1404 = vsyncpa [#allocation5], 1 }
 0x1b1   :  { %1406 = vsyncpa [#allocation5 + $0x1], 1 }

</bundles_post_ra>
